<compile_context>
chip_gen: v6e
topology: v6e:2x2x1
jax: 0.10.0
libtpu: 0.0.40
codegen_flags: <defaults>
</compile_context>

<pallas_src>
import functools
import math

import jax
import jax.numpy as jnp
from jax.experimental import pallas as pl
from jax.experimental.pallas import tpu as pltpu


def _rmsnorm_kernel(x_ref, w_ref, o_ref, *, eps: float):
    # Upcast to f32 for the reduction (matches x.float() in PyTorch).
    x_f32 = x_ref[...].astype(jnp.float32)
    # Mean of squares over the last (hidden / lane) axis -> XLU; rsqrt -> EUP.
    ms = jnp.mean(x_f32 * x_f32, axis=-1, keepdims=True)
    normed = x_f32 * jax.lax.rsqrt(ms + eps)
    # Cast back to input dtype (matches upcasted_x.to(x.dtype)), then multiply by
    # the (f32) weight -> output dtype is the promoted dtype.
    normed = normed.astype(x_ref.dtype)
    o_ref[...] = (w_ref[...] * normed).astype(o_ref.dtype)


def _align_up(n: int, m: int) -> int:
    return ((n + m - 1) // m) * m


# VMEM budget for the double-buffered input + output blocks (conservative enough
# for v7x's 64 MiB physical VMEM and v5e's defaults once the limit is raised).
_BLOCK_VMEM_BUDGET = 28 * 1024 * 1024
_VMEM_LIMIT_BYTES = 48 * 1024 * 1024
_MAX_ROW_BLOCK = 1024


def _choose_row_block(rows: int, hidden: int, x_bytes: int, out_bytes: int) -> int:
    # Sublane packing of the narrowest dtype touched: bf16 -> 16, f32 -> 8, int8 -> 32.
    packing = max(8, 32 // max(1, min(x_bytes, out_bytes)))
    # Double-buffered input block + double-buffered output block per row.
    per_row = 2 * hidden * x_bytes + 2 * hidden * out_bytes
    rb = max(packing, _BLOCK_VMEM_BUDGET // max(per_row, 1))
    rb = min(rb, _MAX_ROW_BLOCK)
    rb = max(packing, (rb // packing) * packing)        # align down to packing
    rb = min(rb, _align_up(rows, packing))              # don't exceed the array
    # Keep at least 2 grid blocks when there is enough work (v7x megacore sharding).
    if pl.cdiv(rows, rb) < 2 and rows > packing:
        rb = max(packing, _align_up(pl.cdiv(rows, 2), packing))
    return rb


def rmsnorm(x: jax.Array, weight: jax.Array, eps: float = 1e-6,
            row_block: int | None = None) -> jax.Array:
    """Pallas RMSNorm over the last axis of x (matches bit_llm Norm.forward)."""
    hidden = x.shape[-1]
    assert weight.shape == (hidden,)

    orig_shape = x.shape
    rows = int(math.prod(orig_shape[:-1]))
    x2d = x.reshape(rows, hidden)
    w2d = weight.reshape(1, hidden)

    # Output dtype follows PyTorch promotion: weight (f32) * tensor of x.dtype.
    out_dtype = jnp.promote_types(x.dtype, weight.dtype)

    x_bytes = jnp.dtype(x.dtype).itemsize
    out_bytes = jnp.dtype(out_dtype).itemsize
    if row_block is None:
        row_block = _choose_row_block(rows, hidden, x_bytes, out_bytes)

    grid = (pl.cdiv(rows, row_block),)

    kernel = functools.partial(_rmsnorm_kernel, eps=eps)

    out2d = pl.pallas_call(
        kernel,
        out_shape=jax.ShapeDtypeStruct((rows, hidden), out_dtype),
        grid_spec=pltpu.PrefetchScalarGridSpec(
            num_scalar_prefetch=0,
            grid=grid,
            in_specs=[
                pl.BlockSpec((row_block, hidden), lambda i: (i, 0)),
                # Constant index_map -> weight stays resident in VMEM across steps.
                pl.BlockSpec((1, hidden), lambda i: (0, 0)),
            ],
            out_specs=pl.BlockSpec((row_block, hidden), lambda i: (i, 0)),
        ),
        compiler_params=pltpu.CompilerParams(
            dimension_semantics=("parallel",),
            vmem_limit_bytes=_VMEM_LIMIT_BYTES,
        ),
    )(x2d, w2d)

    return out2d.reshape(orig_shape)


def _reference(x, weight, eps):
    up = x.astype(jnp.float32)
    up = up * jax.lax.rsqrt(jnp.mean(up * up, axis=-1, keepdims=True) + eps)
    return weight * up.astype(x.dtype)


if __name__ == "__main__":
    key = jax.random.PRNGKey(0)

    # --- Test 1: small bf16 input (typical call site), divisible row count. ---
    batch, seq, hidden = 2, 8, 32
    # nn.Parameter(torch.ones(hidden_size))
    weight = jnp.ones((hidden,), dtype=jnp.float32)
    k1, k2 = jax.random.split(key)
    x = jax.random.normal(k1, (batch, seq, hidden), dtype=jnp.float32).astype(jnp.bfloat16)

    out = jax.block_until_ready(rmsnorm(x, weight, eps=1e-6))
    ref = _reference(x, weight, 1e-6)
    assert out.shape == ref.shape and out.dtype == ref.dtype
    assert jnp.allclose(out, ref, atol=1e-2, rtol=1e-2)

    # --- Test 2: f32 input, row count not divisible by the chosen block (tail path). ---
    x2 = jax.random.normal(k2, (2, 20, hidden), dtype=jnp.float32)
    out2 = jax.block_until_ready(rmsnorm(x2, weight, eps=1e-6))
    ref2 = _reference(x2, weight, 1e-6)
    assert out2.shape == ref2.shape and out2.dtype == ref2.dtype
    assert jnp.allclose(out2, ref2, atol=1e-5, rtol=1e-5)

    print("KERNEL_OK")
</pallas_src>

<mosaic_0001>
module attributes {stable_mosaic.version = 11 : i64} {
  func.func @_rmsnorm_kernel(%arg0: i32, %arg1: memref<16x32xbf16, #tpu.memory_space<vmem>>, %arg2: memref<1x32xf32, #tpu.memory_space<vmem>>, %arg3: memref<16x32xf32, #tpu.memory_space<vmem>>) attributes {dimension_semantics = [#tpu.dimension_semantics<parallel>], iteration_bounds = array<i64: 1>, scalar_prefetch = 0 : i64, scratch_operands = 0 : i64, tpu.core_type = #tpu.core_type<tc>, window_params = [{transform_indices = @transform_0, window_bounds = array<i64: 16, 32>}, {pipeline_mode = #tpu.pipeline_mode<synchronous>, transform_indices = @transform_1, window_bounds = array<i64: 1, 32>}, {transform_indices = @transform_2, window_bounds = array<i64: 16, 32>}]} {
    %c0 = arith.constant 0 : index
    %c0_0 = arith.constant 0 : index
    %0 = vector.load %arg1[%c0, %c0_0] : memref<16x32xbf16, #tpu.memory_space<vmem>>, vector<16x32xbf16>
    %1 = arith.extf %0 : vector<16x32xbf16> to vector<16x32xf32>
    %2 = arith.mulf %1, %1 : vector<16x32xf32>
    %cst = arith.constant dense<0.000000e+00> : vector<16xf32>
    %3 = vector.multi_reduction <add>, %2, %cst [1] : vector<16x32xf32> to vector<16xf32>
    %4 = vector.shape_cast %3 : vector<16xf32> to vector<16x1xf32>
    %cst_1 = arith.constant 3.200000e+01 : f32
    %5 = vector.broadcast %cst_1 : f32 to vector<16x1xf32>
    %6 = arith.divf %4, %5 : vector<16x1xf32>
    %cst_2 = arith.constant 9.99999997E-7 : f32
    %7 = vector.broadcast %cst_2 : f32 to vector<16x1xf32>
    %8 = arith.addf %6, %7 : vector<16x1xf32>
    %9 = math.rsqrt %8 : vector<16x1xf32>
    %10 = vector.broadcast %9 : vector<16x1xf32> to vector<16x32xf32>
    %11 = arith.mulf %1, %10 : vector<16x32xf32>
    %12 = arith.truncf %11 : vector<16x32xf32> to vector<16x32xbf16>
    %c0_3 = arith.constant 0 : index
    %c0_4 = arith.constant 0 : index
    %13 = vector.load %arg2[%c0_3, %c0_4] : memref<1x32xf32, #tpu.memory_space<vmem>>, vector<1x32xf32>
    %14 = arith.extf %12 : vector<16x32xbf16> to vector<16x32xf32>
    %15 = vector.broadcast %13 : vector<1x32xf32> to vector<16x32xf32>
    %16 = arith.mulf %15, %14 : vector<16x32xf32>
    %c0_5 = arith.constant 0 : index
    %c0_6 = arith.constant 0 : index
    %17 = vector.load %arg3[%c0_5, %c0_6] : memref<16x32xf32, #tpu.memory_space<vmem>>, vector<16x32xf32>
    tpu.vector_store %arg3[%c0_5, %c0_6], %16 {strides = array<i32>} : memref<16x32xf32, #tpu.memory_space<vmem>>, vector<16x32xf32>,
    return
  }
  func.func @transform_0(%arg0: i32) -> (i32, i32) {
    %c0_i32 = arith.constant 0 : i32
    %c0_i32_0 = arith.constant 0 : i32
    return %arg0, %c0_i32 : i32, i32
  }
  func.func @transform_1(%arg0: i32) -> (i32, i32) {
    %c0_i32 = arith.constant 0 : i32
    %c0_i32_0 = arith.constant 0 : i32
    %c0_i32_1 = arith.constant 0 : i32
    return %c0_i32, %c0_i32_0 : i32, i32
  }
  func.func @transform_2(%arg0: i32) -> (i32, i32) {
    %c0_i32 = arith.constant 0 : i32
    %c0_i32_0 = arith.constant 0 : i32
    return %arg0, %c0_i32 : i32, i32
  }
}

</mosaic_0001>

<bundles_post_ra>
// kernel: tpu_custom_call.1
= control target key start
LH: loop header
LB: loop body
LE: loop exit
PB: predicated region body
PF: predicated region fallthrough
CT: control target
= control target key end

     0   :  { %7 = vsyncpa [#allocation3], 0  ;;  %s172_s0 = inlined_call_operand.hbm [shape: bf16[16,32], index: 0, kind: input, shape index: {}]   ;;  %s173_s1 = inlined_call_operand.vmem [shape: f32[1,32], index: 1, kind: input, shape index: {}]   ;;  %s174_s2 = inlined_call_operand.hbm [shape: f32[16,32], index: 2, kind: output, shape index: {}]  }
   0x1   :  { %8 = vsyncpa [#allocation4], 0  ;;  %s138_s9 = smov [#allocation2]  }
   0x2   :  { %s14_s10 = sshll.u32 %s138_s9, 4  ;;  %s15_s10 = int_to_ptr.vmem [resolvable:$true] %s14_s10 }
   0x3   :  { %s102_s11 = scalar_lea.vmem %s15_s10, 128  ;;  %p107_p1 = scmp.lt.s32.totalorder %s15_s10, %s15_s10 }
   0x4   :  { %p103_p0 = scmp.ne.s32.totalorder %s15_s10, %s102_s11  ;;  %p108_p2 = scmp.lt.s32.totalorder %s102_s11, %s102_s11 }
   0x6   :  { %p109_p3 = por %p108_p2, %p107_p1 }
   0x8   :  { %p110_p4 = pnand %p109_p3, %p103_p0 }
   0xa   :  { %113 = shalt.err (!%p110_p4)
}
   0xb   :  { %s139_s12 = smov 64   ;;  %s140_s13 = smov 4  }
   0xc   :  { %20 = dma.hbm_to_vmem [thread:$0]  %s172_s0, 128, %s15_s10, [#allocation3], %s139_s12, %s139_s12, %s140_s13  }
   0xd   :  { %134 = dma.done.wait [#allocation3], 128  }
   0xe   :  { %135 = vsyncadd [#allocation3], 4294967168  ;;  %v81_v0 = vld [vmem:[#allocation2] sm:$0xff]   ;;  %vm32_vm0 = vcmask 261120   ;;  %s141_s0 = smov [#allocation5]  }
   0xf   :  { %v82_v1 = vunpack.c.l.bf16 %v81_v0  ;;  %v83_v2 = vunpack.c.h.bf16 %v81_v0  ;;  %s67_s16 = sshll.u32 %s141_s0, 4  ;;  %v79_v18 = vld [vmem:[%s173_s1] ss:$0 sm:$0xff]  ;;  %s68_s16 = int_to_ptr.vmem [resolvable:$true] %s67_s16 }
  0x10   :  { %s114_s19 = scalar_lea.vmem %s68_s16, 256  ;;  %p119_p6 = scmp.lt.s32.totalorder %s68_s16, %s68_s16 }
  0x11   :  { %v30_v3 = vmul.f32 %v82_v1, %v82_v1  ;;  %v31_v4 = vmul.f32 %v83_v2, %v83_v2  ;;  %p115_p5 = scmp.ne.s32.totalorder %s68_s16, %s114_s19  ;;  %p120_p7 = scmp.lt.s32.totalorder %s114_s19, %s114_s19 }
  0x13   :  { %v33_v5 = vsel %vm32_vm0, %v30_v3, 0.0  ;;  %v36_v6 = vsel %vm32_vm0, %v31_v4, 0.0  ;;  %p121_p8 = por %p120_p7, %p119_p6 }
  0x14   :  { %34 = vadd.xlane.f32.xlu0 %v33_v5 }
  0x15   :  { %p122_p9 = pnand %p121_p8, %p115_p5 }
  0x18   :  { %37 = vadd.xlane.f32.xlu0 %v36_v6 }
  0x9d   :  { %v35_v7 = vpop.xlane.xlu0 %34 }
  0x9e   :  { %v40_v8 = vmul.f32 0.03125, %v35_v7 }
  0xa0   :  { %v42_v9 = vadd.f32 1e-06, %v40_v8 }
  0xa1   :  { %v38_v10 = vpop.xlane.xlu0 %37 }
  0xa2   :  { %v41_v11 = vmul.f32 0.03125, %v38_v10  ;;  %90 = vrsqrt.f32 %v42_v9 }
  0xa4   :  { %v43_v12 = vadd.f32 1e-06, %v41_v11 }
  0xa6   :  { %92 = vrsqrt.f32 %v43_v12 }
  0xaf   :  { %v91_v13 = vpop.eup %90 }
  0xb0   :  { %v46_v15 = vmul.f32 %v91_v13, %v82_v1 }
  0xb3   :  { %v93_v14 = vpop.eup %92 }
  0xb4   :  { %v47_v16 = vmul.f32 %v93_v14, %v83_v2 }
  0xb6   :  { %v48_v17 = vpack.c.bf16 %v47_v16, %v46_v15 }
  0xb8   :  { %v50_v19 = vunpack.c.l.bf16 %v48_v17  ;;  %v51_v20 = vunpack.c.h.bf16 %v48_v17 }
  0xba   :  { %v58_v21 = vmul.f32 %v79_v18, %v50_v19  ;;  %v59_v22 = vmul.f32 %v79_v18, %v51_v20 }
  0xbc   :  { %60 = vst.msk [vmem:[#allocation5] sm:$0xff] %vm32_vm0, %v58_v21  ;;  %61 = vst.msk [vmem:[#allocation5 + $0x8] sm:$0xff] %vm32_vm0, %v59_v22 }
  0xbd   :  { %125 = shalt.err (!%p122_p9)
}
  0xbe   :  { %s142_s20 = smov 128   ;;  %s143_s21 = smov 8  }
  0xbf   :  { %73 = dma.vmem_to_hbm [thread:$0]  %s68_s16, 256, %s174_s2, [#allocation4], %s142_s20, %s142_s20, %s143_s21  }
  0xc0   :  { %136 = dma.done.wait [#allocation4], 256  }
  0xc1   :  { %137 = vsyncadd [#allocation4], 4294967040 }
  0xc2   :  { %77 = vsyncpa [#allocation3], 1 }
  0xc3   :  { %78 = vsyncpa [#allocation4], 1 }

</bundles_post_ra>
